<compile_context>
chip_gen: v7x
topology: tpu7x:2x2x1
jax: 0.10.0
libtpu: 0.0.40
codegen_flags: <defaults>
</compile_context>

<pallas_src>
import jax
import jax.numpy as jnp
from jax.experimental import pallas as pl
from jax.experimental.pallas import tpu as pltpu


def _coords_concat_kernel(x_ref, coords_ref, o_ref):
    # x_ref:      (Bt, C,       THW)  pass-through feature channels
    # coords_ref: (extra,       THW)  coordinate channels (batch-invariant)
    # o_ref:      (Bt, C+extra, THW)
    bt, c, thw = x_ref.shape
    extra = coords_ref.shape[0]

    # Pass-through of the original feature channels (lane-dense copy).
    o_ref[:, :c, :] = x_ref[...]

    # Coordinate channels, broadcast across the fused batch tile.
    coords = coords_ref[...].astype(o_ref.dtype)
    o_ref[:, c:, :] = jnp.broadcast_to(coords[None, :, :], (bt, extra, thw))


def _round_up(x, m):
    return -(-x // m) * m


def _sublane_multiple(itemsize):
    # fp32 tiles are (8,128); bf16 (16,128); int8 (32,128).
    return 8 * max(1, 4 // max(1, itemsize))


def _default_budget_bytes():
    """Per-step VMEM budget tuned per TPU generation (HBM BW vs scoped VMEM)."""
    try:
        kind = jax.devices()[0].device_kind.lower()
    except Exception:
        kind = ""
    if "v5" in kind and ("lite" in kind or "5e" in kind):
        return 5 << 20   # stays inside v5e's 16 MiB default scoped VMEM when 2x-buffered
    if "v6" in kind:
        return 8 << 20   # ~6 us of DMA per step at ~1.4 TB/s
    if "v7" in kind:
        return 10 << 20  # ~3 us per step at ~3.2 TB/s; well inside 64 MiB VMEM
    return 6 << 20


def _pick_tiles(B, C, C_out, extra, HW, itemsize, budget_bytes):
    """Pick (batch_tile, spatial_tile) sized to ~budget bytes of VMEM per step."""
    sub = _sublane_multiple(itemsize)
    c_pad = _round_up(C, sub)
    co_pad = _round_up(C_out, sub)
    e_pad = _round_up(extra, sub)
    per_hw = (c_pad + co_pad) * itemsize        # VMEM bytes / spatial elem / batch row
    coords_per_hw = e_pad * itemsize

    def step_vmem(bt, thw):
        return bt * per_hw * thw + coords_per_hw * thw

    # Spatial tile: the full extent if it fits, otherwise the largest multiple
    # of 128 that fits the budget (cdiv grid with a padded boundary block when
    # H*W is not divisible; never falls back to an unbounded full-extent block).
    if HW <= 128 or step_vmem(1, HW) <= budget_bytes:
        thw = HW
    else:
        max_thw = max(128, (budget_bytes // (per_hw + coords_per_hw)) // 128 * 128)
        if HW % 128 == 0:
            divs = [d for d in range(128, min(max_thw, HW) + 1, 128) if HW % d == 0]
            thw = max(divs) if divs else 128
        else:
            thw = min(max_thw, HW)

    # Batch tile: fuse batches until the per-step footprint reaches the budget.
    bt_cap = (budget_bytes - coords_per_hw * thw) // max(per_hw * thw, 1)
    bt = int(min(B, max(1, bt_cap)))

    # For large inputs keep the grid at >= ~4 steps so double-buffering (and
    # megacore sharding) stays alive.
    total_vmem_like = B * HW * per_hw
    while (total_vmem_like > 4 * budget_bytes
           and pl.cdiv(B, bt) * pl.cdiv(HW, thw) < 4):
        if bt > 1:
            bt = -(-bt // 2)
        elif (thw // 2) // 128 * 128 >= 128:
            thw = (thw // 2) // 128 * 128
        else:
            break

    return int(bt), int(thw)


def coordinates_encoding_2d(x: jax.Array, with_r: bool = False,
                            budget_bytes: int | None = None) -> jax.Array:
    """Pallas equivalent of _CoordinatesEncoding2d.forward (NCHW)."""
    B, C, H, W = x.shape
    extra = 3 if with_r else 2
    C_out = C + extra
    HW = H * W
    if budget_bytes is None:
        budget_bytes = _default_budget_bytes()

    # Tiny (extra, H*W) coordinate slab, computed once (torch semantics).
    # Note: cast to x.dtype (for bf16 inputs the coords lose some precision,
    # consistent with concatenating into the input's dtype).
    y = (jnp.arange(H, dtype=jnp.float32) / jnp.float32(H))[:, None]
    xc = (jnp.arange(W, dtype=jnp.float32) / jnp.float32(W))[None, :]
    yg = jnp.broadcast_to(y, (H, W))
    xg = jnp.broadcast_to(xc, (H, W))
    chans = [yg, xg]
    if with_r:
        chans.append(jnp.sqrt(yg * yg + xg * xg))
    coords = jnp.stack(chans, axis=0).reshape(extra, HW).astype(x.dtype)

    # Lane-dense layout: flattened spatial extent on the last axis.
    x_flat = x.reshape(B, C, HW)

    itemsize = x.dtype.itemsize
    Bt, THW = _pick_tiles(B, C, C_out, extra, HW, itemsize, budget_bytes)

    # Spatial is the OUTER grid axis, batch the INNER one: the coords block
    # index is constant over the inner axis, so its DMA is elided for all but
    # the first step of each spatial tile (one total pass over the slab).
    grid = (pl.cdiv(HW, THW), pl.cdiv(B, Bt))

    # Explicit scoped-VMEM limit sized to the real double-buffered footprint
    # (channel dims padded to sublane multiples).
    sub = _sublane_multiple(itemsize)
    step_vmem = (Bt * (_round_up(C, sub) + _round_up(C_out, sub))
                 + _round_up(extra, sub)) * THW * itemsize
    vmem_limit = int(min(2 * step_vmem + (6 << 20), 56 << 20))

    out_flat = pl.pallas_call(
        _coords_concat_kernel,
        out_shape=jax.ShapeDtypeStruct((B, C_out, HW), x.dtype),
        grid_spec=pltpu.PrefetchScalarGridSpec(
            num_scalar_prefetch=0,
            grid=grid,
            in_specs=[
                pl.BlockSpec((Bt, C, THW), lambda s, b: (b, 0, s)),
                # Constant block index across the inner (batch) axis.
                pl.BlockSpec((extra, THW), lambda s, b: (0, s)),
            ],
            out_specs=pl.BlockSpec((Bt, C_out, THW), lambda s, b: (b, 0, s)),
        ),
        compiler_params=pltpu.CompilerParams(
            dimension_semantics=("parallel", "parallel"),
            vmem_limit_bytes=vmem_limit),
    )(x_flat, coords)

    return out_flat.reshape(B, C_out, H, W)


def _reference(x: jax.Array, with_r: bool = False) -> jax.Array:
    B, C, H, W = x.shape
    y = (jnp.arange(H, dtype=jnp.float32)[:, None] * jnp.ones((1, W), jnp.float32)) / H
    xc = (jnp.arange(W, dtype=jnp.float32)[None, :] * jnp.ones((H, 1), jnp.float32)) / W
    coords = jnp.stack((y, xc), axis=0)
    if with_r:
        r = jnp.sqrt(y ** 2 + xc ** 2)[None]
        coords = jnp.concatenate((coords, r), axis=0)
    coords = jnp.broadcast_to(coords[None], (B,) + coords.shape).astype(x.dtype)
    return jnp.concatenate((x, coords), axis=1)


if __name__ == "__main__":
    key = jax.random.PRNGKey(0)

    # Small default-path test (single-block grid), module-default with_r=False.
    B, C, H, W = 2, 4, 16, 16
    x = jax.random.normal(key, (B, C, H, W), dtype=jnp.float32)

    out = jax.block_until_ready(coordinates_encoding_2d(x, with_r=False))
    ref = _reference(x, with_r=False)
    assert out.shape == (B, C + 2, H, W)
    assert jnp.allclose(out, ref, atol=1e-6)

    # with_r=True path.
    out_r = jax.block_until_ready(coordinates_encoding_2d(x, with_r=True))
    ref_r = _reference(x, with_r=True)
    assert out_r.shape == (B, C + 3, H, W)
    assert jnp.allclose(out_r, ref_r, atol=1e-6)

    # Exercise the tiled path: H*W = 960 (not a multiple of 128) with a tiny
    # budget forces a multi-step grid with a padded boundary spatial block and
    # a non-dividing batch tile (cdiv on both axes).
    x2 = jax.random.normal(jax.random.PRNGKey(1), (3, 4, 24, 40), dtype=jnp.float32)
    out2 = jax.block_until_ready(
        coordinates_encoding_2d(x2, with_r=True, budget_bytes=16 * 1024))
    ref2 = _reference(x2, with_r=True)
    assert out2.shape == (3, 4 + 3, 24, 40)
    assert jnp.allclose(out2, ref2, atol=1e-6)

    print("KERNEL_OK")
</pallas_src>

<mosaic_0001>
module attributes {stable_mosaic.version = 11 : i64} {
  func.func @_coords_concat_kernel(%arg0: i32, %arg1: i32, %arg2: memref<2x4x256xf32, #tpu.memory_space<vmem>>, %arg3: memref<2x256xf32, #tpu.memory_space<vmem>>, %arg4: memref<2x6x256xf32, #tpu.memory_space<vmem>>) attributes {dimension_semantics = [#tpu.dimension_semantics<parallel>, #tpu.dimension_semantics<parallel>], iteration_bounds = array<i64: 1, 1>, scalar_prefetch = 0 : i64, scratch_operands = 0 : i64, tpu.core_type = #tpu.core_type<tc>, window_params = [{transform_indices = @transform_0, window_bounds = array<i64: 2, 4, 256>}, {transform_indices = @transform_1, window_bounds = array<i64: 2, 256>}, {transform_indices = @transform_2, window_bounds = array<i64: 2, 6, 256>}]} {
    %c0 = arith.constant 0 : index
    %c0_0 = arith.constant 0 : index
    %c0_1 = arith.constant 0 : index
    %0 = vector.load %arg2[%c0, %c0_0, %c0_1] : memref<2x4x256xf32, #tpu.memory_space<vmem>>, vector<2x4x256xf32>
    %c0_2 = arith.constant 0 : index
    %c0_3 = arith.constant 0 : index
    %c0_4 = arith.constant 0 : index
    %1 = vector.load %arg4[%c0_2, %c0_3, %c0_4] : memref<2x6x256xf32, #tpu.memory_space<vmem>>, vector<2x4x256xf32>
    tpu.vector_store %arg4[%c0_2, %c0_3, %c0_4], %0 {strides = array<i32>} : memref<2x6x256xf32, #tpu.memory_space<vmem>>, vector<2x4x256xf32>,
    %c0_5 = arith.constant 0 : index
    %c0_6 = arith.constant 0 : index
    %2 = vector.load %arg3[%c0_5, %c0_6] : memref<2x256xf32, #tpu.memory_space<vmem>>, vector<2x256xf32>
    %3 = vector.shape_cast %2 : vector<2x256xf32> to vector<1x2x256xf32>
    %4 = vector.shape_cast %3 : vector<1x2x256xf32> to vector<1x2x256xf32>
    %5 = vector.broadcast %4 : vector<1x2x256xf32> to vector<2x2x256xf32>
    %c0_7 = arith.constant 0 : index
    %c4 = arith.constant 4 : index
    %c0_8 = arith.constant 0 : index
    %6 = vector.load %arg4[%c0_7, %c4, %c0_8] : memref<2x6x256xf32, #tpu.memory_space<vmem>>, vector<2x2x256xf32>
    tpu.vector_store %arg4[%c0_7, %c4, %c0_8], %5 {strides = array<i32>} : memref<2x6x256xf32, #tpu.memory_space<vmem>>, vector<2x2x256xf32>,
    return
  }
  func.func @transform_0(%arg0: i32, %arg1: i32) -> (i32, i32, i32) {
    %c0_i32 = arith.constant 0 : i32
    %c0_i32_0 = arith.constant 0 : i32
    return %arg1, %c0_i32, %arg0 : i32, i32, i32
  }
  func.func @transform_1(%arg0: i32, %arg1: i32) -> (i32, i32) {
    %c0_i32 = arith.constant 0 : i32
    %c0_i32_0 = arith.constant 0 : i32
    return %c0_i32, %arg0 : i32, i32
  }
  func.func @transform_2(%arg0: i32, %arg1: i32) -> (i32, i32, i32) {
    %c0_i32 = arith.constant 0 : i32
    %c0_i32_0 = arith.constant 0 : i32
    return %arg1, %c0_i32, %arg0 : i32, i32, i32
  }
}

</mosaic_0001>

<bundles_post_ra>
// kernel: tpu_custom_call.1
= control target key start
LH: loop header
LB: loop body
LE: loop exit
PB: predicated region body
PF: predicated region fallthrough
CT: control target
= control target key end

     0   :  { %7 = vsyncpa [#allocation3], 0  ;;  %s193_s0 = inlined_call_operand.hbm [shape: f32[2,4,256], index: 0, kind: input, shape index: {}]   ;;  %s194_s1 = inlined_call_operand.hbm [shape: f32[2,256], index: 1, kind: input, shape index: {}]   ;;  %s195_s2 = inlined_call_operand.vmem [shape: f32[2,6,256], index: 2, kind: output, shape index: {}]  }
   0x1   :  { %8 = vsyncpa [#allocation5], 0  ;;  %s126_s9 = smov [#allocation2]   ;;  %s78_s13 = scalar_lea.hbm %s193_s0, 256 }
   0x2   :  { %s14_s10 = sshll.u32 %s126_s9, 4  ;;  %p79_p0 = scmp.ne.s32.totalorder %s193_s0, %s78_s13  ;;  %s15_s10 = int_to_ptr.vmem [resolvable:$true] %s14_s10 }
   0x3   :  { %p82_p1 = scmp.lt.u32.totalorder %s78_s13, %s193_s0 }
   0x5   :  { %p84_p2 = pnand %p82_p1, %p79_p0 }
   0x7   :  { %87 = shalt.err (!%p84_p2)
}
   0x8   :  { %s88_s18 = scalar_lea.vmem %s15_s10, 256  ;;  %p93_p4 = scmp.lt.s32.totalorder %s15_s10, %s15_s10 }
   0x9   :  { %p89_p3 = scmp.ne.s32.totalorder %s15_s10, %s88_s18  ;;  %p94_p5 = scmp.lt.s32.totalorder %s88_s18, %s88_s18 }
   0xb   :  { %p95_p6 = por %p94_p5, %p93_p4 }
   0xd   :  { %p96_p7 = pnand %p95_p6, %p89_p3 }
   0xf   :  { %99 = shalt.err (!%p96_p7)
}
  0x10   :  { %s127_s19 = smov 128   ;;  %s128_s20 = smov 8  }
  0x11   :  { %20 = dma.hbm_to_vmem [thread:$0]  %s193_s0, 256, %s15_s10, [#allocation3], %s127_s19, %s127_s19, %s128_s20  }
  0x12   :  { %s129_s23 = smov [#allocation4]   ;;  %s100_s27 = scalar_lea.hbm %s194_s1, 64 }
  0x13   :  { %s27_s24 = sshll.u32 %s129_s23, 4  ;;  %p101_p8 = scmp.ne.s32.totalorder %s194_s1, %s100_s27  ;;  %s28_s24 = int_to_ptr.vmem [resolvable:$true] %s27_s24 }
  0x14   :  { %p104_p9 = scmp.lt.u32.totalorder %s100_s27, %s194_s1 }
  0x16   :  { %p106_p10 = pnand %p104_p9, %p101_p8 }
  0x18   :  { %109 = shalt.err (!%p106_p10)
}
  0x19   :  { %s110_s4 = scalar_lea.vmem %s28_s24, 64  ;;  %p115_p12 = scmp.lt.s32.totalorder %s28_s24, %s28_s24 }
  0x1a   :  { %p111_p11 = scmp.ne.s32.totalorder %s28_s24, %s110_s4  ;;  %p116_p13 = scmp.lt.s32.totalorder %s110_s4, %s110_s4 }
  0x1c   :  { %p117_p0 = por %p116_p13, %p115_p12 }
  0x1e   :  { %p118_p1 = pnand %p117_p0, %p111_p11 }
  0x20   :  { %121 = shalt.err (!%p118_p1)
}
  0x21   :  { %30 = dma.hbm_to_vmem [thread:$0]  %s194_s1, 64, %s28_s24, [#allocation5]  }
  0x22   :  { %122 = dma.done.wait [#allocation3], 256  }
  0x23   :  { %123 = vsyncadd [#allocation3], 4294967040 }
  0x24   :  { %124 = dma.done.wait [#allocation5], 64  }
  0x25   :  { %125 = vsyncadd [#allocation5], 4294967232  ;;  %v37_v0 = vld [vmem:[#allocation2] sm:$0xff]  ;;  %v38_v1 = vld [vmem:[#allocation2 + $0x8] sm:$0xff] }
  0x26   :  { %v71_v2 = vld.sshfl [vmem:[#allocation4] sm:$0x33 pattern:$0x76325410]  ;;  %45 = vst [vmem:[%s195_s2] sm:$0xf] %v37_v0  ;;  %v41_v3 = vcombine.high %v37_v0, %v37_v0  ;;  %v42_v4 = vcombine.high %v38_v1, %v38_v1 }
  0x27   :  { %47 = vst [vmem:[%s195_s2 + $0x10] sm:$0xf] %v38_v1  ;;  %v58_v5 = vcombine.low %v71_v2, %v71_v2  ;;  %62 = vst [vmem:[%s195_s2 + $0x8] sm:$0x30] %v71_v2 }
  0x28   :  { %64 = vst [vmem:[%s195_s2 + $0x18] sm:$0x30] %v71_v2  ;;  %46 = vst [vmem:[%s195_s2 + $0x8] sm:$0xf] %v41_v3 }
  0x29   :  { %48 = vst [vmem:[%s195_s2 + $0x18] sm:$0xf] %v42_v4  ;;  %61 = vst [vmem:[%s195_s2] sm:$0x30] %v58_v5 }
  0x2a   :  { %63 = vst [vmem:[%s195_s2 + $0x10] sm:$0x30] %v58_v5 }
  0x2b   :  { %69 = vsyncpa [#allocation3], 1 }
  0x2c   :  { %70 = vsyncpa [#allocation5], 1 }

</bundles_post_ra>
